<compile_context>
chip_gen: v6e
topology: v6e:2x2x1
jax: 0.10.0
libtpu: 0.0.40
codegen_flags: <defaults>
</compile_context>

<pallas_src>
import jax
import jax.numpy as jnp
from jax import lax
from jax.experimental import pallas as pl
from jax.experimental.pallas import tpu as pltpu


def _largest_divisor_tile(n, cap, quantum=8):
    """Largest tile <= cap that exactly divides n (multiple of `quantum`);
    falls back to the full dimension if no such divisor exists."""
    if n <= cap:
        return n
    cap = max(quantum, (cap // quantum) * quantum)
    for t in range(cap, quantum - 1, -quantum):
        if n % t == 0:
            return t
    return n


def repeat_linear_kernel(x_ref, w_ref, lw_ref, lb_ref, o_ref, acc_ref):
    # x_ref  : (TB, TS, D)   input tile for this (batch-tile, step-tile)
    # w_ref  : (1, 1, D)     per-feature gate, constant index map (resident)
    # lw_ref : (O_pad, D)    Linear weight, torch layout, pre-scaled by 1/S
    # lb_ref : (1, O_pad)    Linear bias (zero-padded)
    # o_ref  : (TB, O_pad)   output tile (constant across the S grid axis)
    # acc_ref: (TB, D) f32   VMEM accumulator of sum_S relu(w * x)
    s = pl.program_id(1)

    @pl.when(s == 0)
    def _init():
        acc_ref[...] = jnp.zeros_like(acc_ref)

    # VPU elementwise gate + relu in f32, then sublane reduce over TS.
    gated = jnp.maximum(x_ref[...].astype(jnp.float32) * w_ref[...], 0.0)
    acc_ref[...] += jnp.sum(gated, axis=1)

    @pl.when(s == pl.num_programs(1) - 1)
    def _finalize():
        m = acc_ref[...]                                   # (TB, D) f32
        # m @ lw.T on the MXU; lw stays in torch (O, D) layout (no wrapper
        # transpose) by contracting the last dim of both operands.
        y = lax.dot_general(
            m, lw_ref[...],
            dimension_numbers=(((1,), (1,)), ((), ())),
            preferred_element_type=jnp.float32)
        o_ref[...] = (y + lb_ref[...]).astype(o_ref.dtype)


def repeat_linear(x, w, lin_w, lin_b, *, tb=None, ts=None):
    """x: (B, S, D); w: (D,); lin_w: (O, D) torch layout; lin_b: (O,)."""
    B, S, D = x.shape
    O = lin_w.shape[0]

    # --- tile selection ------------------------------------------------------
    # Batch tile (parallel axis). It is the second-to-last dim of the output
    # block, so it must be a multiple of 8 or equal the full B.
    if tb is None:
        tb = _largest_divisor_tile(B, 256)
    # Step tile (reduction axis). Budget ~8 MiB per x buffer so the
    # double-buffered x tiles fit comfortably inside v7x's 32 MiB scoped VMEM.
    if ts is None:
        x_budget = 8 * 1024 * 1024
        ts_cap = max(8, x_budget // max(1, tb * D * 4))
        ts = _largest_divisor_tile(S, min(512, ts_cap))

    grid = (B // tb, S // ts)

    # --- parameter prep (one-time in a real model; cheap O*D ops) ------------
    # Fold the mean's 1/S into the Linear weight: mean(r) @ W.T == sum(r) @ (W/S).T
    lw = lin_w.astype(jnp.float32) * (1.0 / S)
    # Lane-dense output: pad O up to a multiple of 128 with zero weight rows /
    # zero bias so padded lanes are exactly 0, then slice them off the result.
    o_pad = max(128, ((O + 127) // 128) * 128)
    if o_pad != O:
        lw = jnp.pad(lw, ((0, o_pad - O), (0, 0)))
        lb = jnp.pad(lin_b.astype(jnp.float32), (0, o_pad - O)).reshape(1, o_pad)
    else:
        lb = lin_b.astype(jnp.float32).reshape(1, o_pad)
    w3 = w.astype(jnp.float32).reshape(1, 1, D)

    # --- VMEM budget / compiler params ---------------------------------------
    x_bytes = jnp.dtype(x.dtype).itemsize
    vmem_bytes = (2 * tb * ts * D * x_bytes               # double-buffered x tiles
                  + o_pad * D * 4 + o_pad * 4 + D * 4     # resident params
                  + 2 * tb * o_pad * x_bytes              # double-buffered out tile
                  + tb * D * 4)                           # accumulator scratch
    vmem_limit = int(min(48 * 1024 * 1024, max(4 * 1024 * 1024, 2 * vmem_bytes)))

    out_padded = pl.pallas_call(
        repeat_linear_kernel,
        out_shape=jax.ShapeDtypeStruct((B, o_pad), x.dtype),
        grid_spec=pltpu.PrefetchScalarGridSpec(
            num_scalar_prefetch=0,
            grid=grid,
            in_specs=[
                pl.BlockSpec((tb, ts, D), lambda b, s: (b, s, 0)),
                pl.BlockSpec((1, 1, D), lambda b, s: (0, 0, 0)),   # resident gate
                pl.BlockSpec((o_pad, D), lambda b, s: (0, 0)),     # resident weight
                pl.BlockSpec((1, o_pad), lambda b, s: (0, 0)),     # resident bias
            ],
            out_specs=pl.BlockSpec((tb, o_pad), lambda b, s: (b, 0)),
            scratch_shapes=[pltpu.VMEM((tb, D), jnp.float32)],
        ),
        compiler_params=pltpu.CompilerParams(
            dimension_semantics=("parallel", "arbitrary"),
            vmem_limit_bytes=vmem_limit,
        ),
    )(x, w3, lw, lb)

    return out_padded[:, :O] if o_pad != O else out_padded


def repeat_linear_ref(x, w, lin_w, lin_b):
    gated = jnp.maximum(w[None, None, :] * x, 0.0)
    m = jnp.mean(gated, axis=1)
    return m @ lin_w.T + lin_b


if __name__ == "__main__":
    # Small shapes consistent with the module: batch=2, num_steps=8,
    # in_dim=32, out_dim=32.
    B, S, D, O = 2, 8, 32, 32
    key = jax.random.PRNGKey(0)
    kx, kw, klw, klb = jax.random.split(key, 4)

    x = jax.random.normal(kx, (B, S, D), dtype=jnp.float32)
    # self.w = torch.randn(in_dim)  -> standard normal
    w = jax.random.normal(kw, (D,), dtype=jnp.float32)
    # nn.Linear(in_dim, out_dim): weight (out_dim, in_dim), bias (out_dim,),
    # uniform in [-1/sqrt(in_dim), 1/sqrt(in_dim)]
    bound = 1.0 / (D ** 0.5)
    lin_w = jax.random.uniform(klw, (O, D), minval=-bound, maxval=bound,
                               dtype=jnp.float32)
    lin_b = jax.random.uniform(klb, (O,), minval=-bound, maxval=bound,
                               dtype=jnp.float32)

    out = repeat_linear(x, w, lin_w, lin_b)
    out = jax.block_until_ready(out)

    ref = repeat_linear_ref(x, w, lin_w, lin_b)
    assert out.shape == (B, O)
    assert jnp.allclose(out, ref, atol=1e-5, rtol=1e-5), \
        float(jnp.max(jnp.abs(out - ref)))

    print("KERNEL_OK")
</pallas_src>

<mosaic_0001>
module attributes {stable_mosaic.version = 11 : i64} {
  func.func @repeat_linear_kernel(%arg0: i32, %arg1: i32, %arg2: memref<2x8x32xf32, #tpu.memory_space<vmem>>, %arg3: memref<1x1x32xf32, #tpu.memory_space<vmem>>, %arg4: memref<128x32xf32, #tpu.memory_space<vmem>>, %arg5: memref<1x128xf32, #tpu.memory_space<vmem>>, %arg6: memref<2x128xf32, #tpu.memory_space<vmem>>, %arg7: memref<2x32xf32, #tpu.memory_space<vmem>>) attributes {dimension_semantics = [#tpu.dimension_semantics<parallel>, #tpu.dimension_semantics<arbitrary>], iteration_bounds = array<i64: 1, 1>, scalar_prefetch = 0 : i64, scratch_operands = 1 : i64, tpu.core_type = #tpu.core_type<tc>, window_params = [{transform_indices = @transform_0, window_bounds = array<i64: 2, 8, 32>}, {pipeline_mode = #tpu.pipeline_mode<synchronous>, transform_indices = @transform_1, window_bounds = array<i64: 1, 1, 32>}, {pipeline_mode = #tpu.pipeline_mode<synchronous>, transform_indices = @transform_2, window_bounds = array<i64: 128, 32>}, {pipeline_mode = #tpu.pipeline_mode<synchronous>, transform_indices = @transform_3, window_bounds = array<i64: 1, 128>}, {transform_indices = @transform_4, window_bounds = array<i64: 2, 128>}]} {
    %c0_i32 = arith.constant 0 : i32
    %0 = arith.cmpi eq, %arg1, %c0_i32 : i32
    %1 = arith.extui %0 : i1 to i32
    %c0_i32_0 = arith.constant 0 : i32
    %2 = arith.cmpi ne, %1, %c0_i32_0 : i32
    scf.if %2 {
      %cst_13 = arith.constant 0.000000e+00 : f32
      %16 = vector.broadcast %cst_13 : f32 to vector<2x32xf32>
      %c0_14 = arith.constant 0 : index
      %c0_15 = arith.constant 0 : index
      %17 = vector.load %arg7[%c0_14, %c0_15] : memref<2x32xf32, #tpu.memory_space<vmem>>, vector<2x32xf32>
      tpu.vector_store %arg7[%c0_14, %c0_15], %16 {strides = array<i32>} : memref<2x32xf32, #tpu.memory_space<vmem>>, vector<2x32xf32>,
    } else {
    }
    %c0 = arith.constant 0 : index
    %c0_1 = arith.constant 0 : index
    %c0_2 = arith.constant 0 : index
    %3 = vector.load %arg2[%c0, %c0_1, %c0_2] : memref<2x8x32xf32, #tpu.memory_space<vmem>>, vector<2x8x32xf32>
    %c0_3 = arith.constant 0 : index
    %c0_4 = arith.constant 0 : index
    %c0_5 = arith.constant 0 : index
    %4 = vector.load %arg3[%c0_3, %c0_4, %c0_5] : memref<1x1x32xf32, #tpu.memory_space<vmem>>, vector<1x1x32xf32>
    %5 = vector.broadcast %4 : vector<1x1x32xf32> to vector<2x8x32xf32>
    %6 = arith.mulf %3, %5 : vector<2x8x32xf32>
    %cst = arith.constant 0.000000e+00 : f32
    %7 = vector.broadcast %cst : f32 to vector<2x8x32xf32>
    %8 = arith.maximumf %6, %7 : vector<2x8x32xf32>
    %c0_6 = arith.constant 0 : index
    %c0_7 = arith.constant 0 : index
    %9 = vector.load %arg7[%c0_6, %c0_7] : memref<2x32xf32, #tpu.memory_space<vmem>>, vector<2x32xf32>
    %cst_8 = arith.constant dense<0.000000e+00> : vector<2x32xf32>
    %10 = vector.multi_reduction <add>, %8, %cst_8 [1] : vector<2x8x32xf32> to vector<2x32xf32>
    %11 = arith.addf %9, %10 : vector<2x32xf32>
    %c0_9 = arith.constant 0 : index
    %c0_10 = arith.constant 0 : index
    %12 = vector.load %arg7[%c0_9, %c0_10] : memref<2x32xf32, #tpu.memory_space<vmem>>, vector<2x32xf32>
    tpu.vector_store %arg7[%c0_9, %c0_10], %11 {strides = array<i32>} : memref<2x32xf32, #tpu.memory_space<vmem>>, vector<2x32xf32>,
    %c0_i32_11 = arith.constant 0 : i32
    %13 = arith.cmpi eq, %arg1, %c0_i32_11 : i32
    %14 = arith.extui %13 : i1 to i32
    %c0_i32_12 = arith.constant 0 : i32
    %15 = arith.cmpi ne, %14, %c0_i32_12 : i32
    scf.if %15 {
      %c0_13 = arith.constant 0 : index
      %c0_14 = arith.constant 0 : index
      %16 = vector.load %arg7[%c0_13, %c0_14] : memref<2x32xf32, #tpu.memory_space<vmem>>, vector<2x32xf32>
      %c0_15 = arith.constant 0 : index
      %c0_16 = arith.constant 0 : index
      %17 = vector.load %arg4[%c0_15, %c0_16] : memref<128x32xf32, #tpu.memory_space<vmem>>, vector<128x32xf32>
      %cst_17 = arith.constant dense<0.000000e+00> : vector<2x128xf32>
      %18 = tpu.matmul %16, %17, %cst_17 {dimension_numbers = #tpu.dot_dimension_numbers<[1], [1], [0], [0], [0, 0, 1, 0], [], []>} : vector<2x32xf32>, vector<128x32xf32>, vector<2x128xf32> -> vector<2x128xf32>
      %c0_18 = arith.constant 0 : index
      %c0_19 = arith.constant 0 : index
      %19 = vector.load %arg5[%c0_18, %c0_19] : memref<1x128xf32, #tpu.memory_space<vmem>>, vector<1x128xf32>
      %20 = vector.broadcast %19 : vector<1x128xf32> to vector<2x128xf32>
      %21 = arith.addf %18, %20 : vector<2x128xf32>
      %c0_20 = arith.constant 0 : index
      %c0_21 = arith.constant 0 : index
      %22 = vector.load %arg6[%c0_20, %c0_21] : memref<2x128xf32, #tpu.memory_space<vmem>>, vector<2x128xf32>
      tpu.vector_store %arg6[%c0_20, %c0_21], %21 {strides = array<i32>} : memref<2x128xf32, #tpu.memory_space<vmem>>, vector<2x128xf32>,
    } else {
    }
    return
  }
  func.func @transform_0(%arg0: i32, %arg1: i32) -> (i32, i32, i32) {
    %c0_i32 = arith.constant 0 : i32
    %c0_i32_0 = arith.constant 0 : i32
    return %arg0, %arg1, %c0_i32 : i32, i32, i32
  }
  func.func @transform_1(%arg0: i32, %arg1: i32) -> (i32, i32, i32) {
    %c0_i32 = arith.constant 0 : i32
    %c0_i32_0 = arith.constant 0 : i32
    %c0_i32_1 = arith.constant 0 : i32
    %c0_i32_2 = arith.constant 0 : i32
    return %c0_i32, %c0_i32_0, %c0_i32_1 : i32, i32, i32
  }
  func.func @transform_2(%arg0: i32, %arg1: i32) -> (i32, i32) {
    %c0_i32 = arith.constant 0 : i32
    %c0_i32_0 = arith.constant 0 : i32
    %c0_i32_1 = arith.constant 0 : i32
    return %c0_i32, %c0_i32_0 : i32, i32
  }
  func.func @transform_3(%arg0: i32, %arg1: i32) -> (i32, i32) {
    %c0_i32 = arith.constant 0 : i32
    %c0_i32_0 = arith.constant 0 : i32
    %c0_i32_1 = arith.constant 0 : i32
    return %c0_i32, %c0_i32_0 : i32, i32
  }
  func.func @transform_4(%arg0: i32, %arg1: i32) -> (i32, i32) {
    %c0_i32 = arith.constant 0 : i32
    %c0_i32_0 = arith.constant 0 : i32
    return %arg0, %c0_i32 : i32, i32
  }
}

</mosaic_0001>

<bundles_post_ra>
// kernel: tpu_custom_call.1
= control target key start
LH: loop header
LB: loop body
LE: loop exit
PB: predicated region body
PF: predicated region fallthrough
CT: control target
= control target key end

     0   :  { %vm38_vm0 = vcmask 261120   ;;  %v320_v1 = vmov 0.0   ;;  %vm321_vm1 = vmmov 0   ;;  %vm22_vm2 = vcmask 254976   ;;  %s450_s0 = inlined_call_operand.vmem [shape: f32[2,8,32], index: 0, kind: input, shape index: {}]   ;;  %s451_s1 = inlined_call_operand.vmem [shape: f32[1,1,32], index: 1, kind: input, shape index: {}]   ;;  %s452_s2 = inlined_call_operand.vmem [shape: f32[128,32], index: 2, kind: input, shape index: {}]   ;;  %s453_s3 = inlined_call_operand.vmem [shape: f32[1,128], index: 3, kind: input, shape index: {}]   ;;  %s454_s4 = inlined_call_operand.hbm [shape: f32[2,128], index: 4, kind: output, shape index: {}]  }
   0x1   :  { %v80_v0 = vld [vmem:[%s452_s2 + $0x78] sm:$0xff]  ;;  %260 = vmatprep.subr.mxu0 %v320_v1  ;;  %292 = vmatprep.mubr.msk.f32.mxu0 %vm321_vm1, %v320_v1  ;;  %23 = vst.msk [vmem:[#allocation2] sm:$0x3] %vm22_vm2, %v320_v1  ;;  %v79_v2 = vld [vmem:[%s452_s2 + $0x70] sm:$0xff]  ;;  %v24_v3 = vld [vmem:[%s450_s0] sm:$0xff] }
   0x2   :  { %261 = vmatpush3.xpose.msk.msra.mxu0 %vm38_vm0, %v80_v0  ;;  %v25_v4 = vld [vmem:[%s450_s0 + $0x8] sm:$0xff]  ;;  %v224_v5 = vld [vmem:[%s451_s1] ss:$0 sm:$0xff] }
   0x3   :  { %262 = vmatprep.subr.mxu0 %v320_v1 }
   0x6   :  { %263 = vmatpush3.xpose.msk.msra.mxu0 %vm38_vm0, %v79_v2 }
   0x7   :  { %9 = vsyncpa [#allocation4], 0  ;;  %264 = vmatprep.subr.mxu0 %v320_v1  ;;  %v78_v6 = vld [vmem:[%s452_s2 + $0x68] sm:$0xff]  ;;  %v33_v7 = vmul.f32 %v224_v5, %v24_v3  ;;  %v34_v8 = vmul.f32 %v224_v5, %v25_v4  ;;  %v77_v11 = vld [vmem:[%s452_s2 + $0x60] sm:$0xff]  ;;  %vm55_vm3 = vcmask 1041409   ;;  %s322_s0 = smov [#allocation3]  }
   0x8   :  { %v76_v18 = vld [vmem:[%s452_s2 + $0x58] sm:$0xff]  ;;  %v75_v23 = vld [vmem:[%s452_s2 + $0x50] sm:$0xff]  ;;  %v37_v26 = vld [vmem:[#allocation2] sm:$0x3]  ;;  %s216_s27 = sshll.u32 %s322_s0, 4  ;;  %s217_s27 = int_to_ptr.vmem [resolvable:$true] %s216_s27 }
   0x9   :  { %v35_v9 = vmax.f32 %v33_v7, 0.0  ;;  %v36_v10 = vmax.f32 %v34_v8, 0.0  ;;  %v74_v29 = vld [vmem:[%s452_s2 + $0x48] sm:$0xff]  ;;  %v73_v32 = vld [vmem:[%s452_s2 + $0x40] sm:$0xff]  ;;  %v72_v33 = vld [vmem:[%s452_s2 + $0x38] sm:$0xff]  ;;  %s298_s1 = scalar_lea.vmem %s217_s27, 32  ;;  %p303_p1 = scmp.lt.s32.totalorder %s217_s27, %s217_s27 }
   0xa   :  { %265 = vmatpush3.xpose.msk.msra.mxu0 %vm38_vm0, %v78_v6  ;;  %v71_v34 = vld [vmem:[%s452_s2 + $0x30] sm:$0xff]  ;;  %v70_v35 = vld [vmem:[%s452_s2 + $0x28] sm:$0xff]  ;;  %v69_v36 = vld [vmem:[%s452_s2 + $0x20] sm:$0xff]  ;;  %p299_p0 = scmp.ne.s32.totalorder %s217_s27, %s298_s1  ;;  %p304_p2 = scmp.lt.s32.totalorder %s298_s1, %s298_s1 }
   0xb   :  { %266 = vmatprep.subr.mxu0 %v320_v1  ;;  %v39_v12 = vsel %vm38_vm0, %v35_v9, 0.0  ;;  %v46_v13 = vsel %vm38_vm0, %v36_v10, 0.0  ;;  %v68_v37 = vld [vmem:[%s452_s2 + $0x18] sm:$0xff]  ;;  %v67_v38 = vld [vmem:[%s452_s2 + $0x10] sm:$0xff]  ;;  %v66_v39 = vld [vmem:[%s452_s2 + $0x8] sm:$0xff] }
   0xc   :  { %v40_v14 = vrot.slane %v39_v12, 4  ;;  %v47_v15 = vrot.slane %v46_v13, 4  ;;  %v65_v40 = vld [vmem:[%s452_s2] sm:$0xff]  ;;  %p305_p3 = por %p304_p2, %p303_p1 }
   0xd   :  { %v225_v42 = vld [vmem:[%s453_s3] ss:$0 sm:$0xff] }
   0xe   :  { %267 = vmatpush3.xpose.msk.msra.mxu0 %vm38_vm0, %v77_v11  ;;  %v41_v16 = vadd.f32 %v40_v14, %v39_v12  ;;  %v48_v17 = vadd.f32 %v47_v15, %v46_v13  ;;  %p306_p4 = pnand %p305_p3, %p299_p0 }
   0xf   :  { %268 = vmatprep.subr.mxu0 %v320_v1 }
  0x10   :  { %v42_v19 = vrot.slane %v41_v16, 2  ;;  %v49_v20 = vrot.slane %v48_v17, 2 }
  0x12   :  { %269 = vmatpush3.xpose.msk.msra.mxu0 %vm38_vm0, %v76_v18  ;;  %v43_v21 = vadd.f32 %v42_v19, %v41_v16  ;;  %v50_v22 = vadd.f32 %v49_v20, %v48_v17 }
  0x13   :  { %270 = vmatprep.subr.mxu0 %v320_v1 }
  0x14   :  { %v44_v24 = vrot.slane %v43_v21, 1  ;;  %v51_v25 = vrot.slane %v50_v22, 1 }
  0x16   :  { %271 = vmatpush3.xpose.msk.msra.mxu0 %vm38_vm0, %v75_v23  ;;  %v45_v27 = vadd.f32 %v44_v24, %v43_v21  ;;  %v52_v28 = vadd.f32 %v51_v25, %v50_v22 }
  0x17   :  { %272 = vmatprep.subr.mxu0 %v320_v1 }
  0x18   :  { %v56_v30 = vsel %vm55_vm3, %v52_v28, %v45_v27 }
  0x19   :  { %v58_v31 = vadd.f32 %v56_v30, %v37_v26 }
  0x1a   :  { %273 = vmatpush3.xpose.msk.msra.mxu0 %vm38_vm0, %v74_v29 }
  0x1b   :  { %274 = vmatprep.subr.mxu0 %v320_v1  ;;  %60 = vst.msk [vmem:[#allocation2] sm:$0x3] %vm22_vm2, %v58_v31 }
  0x1e   :  { %275 = vmatpush3.xpose.msk.msra.mxu0 %vm38_vm0, %v73_v32 }
  0x1f   :  { %276 = vmatprep.subr.mxu0 %v320_v1 }
  0x22   :  { %277 = vmatpush3.xpose.msk.msra.mxu0 %vm38_vm0, %v72_v33  ;;  %v64_v41 = vld [vmem:[#allocation2] sm:$0x3] }
  0x23   :  { %278 = vmatprep.subr.mxu0 %v320_v1 }
  0x26   :  { %279 = vmatpush3.xpose.msk.msra.mxu0 %vm38_vm0, %v71_v34 }
  0x27   :  { %280 = vmatprep.subr.mxu0 %v320_v1 }
  0x2a   :  { %281 = vmatpush3.xpose.msk.msra.mxu0 %vm38_vm0, %v70_v35 }
  0x2b   :  { %282 = vmatprep.subr.mxu0 %v320_v1 }
  0x2e   :  { %283 = vmatpush3.xpose.msk.msra.mxu0 %vm38_vm0, %v69_v36 }
  0x2f   :  { %284 = vmatprep.subr.mxu0 %v320_v1 }
  0x32   :  { %285 = vmatpush3.xpose.msk.msra.mxu0 %vm38_vm0, %v68_v37 }
  0x33   :  { %286 = vmatprep.subr.mxu0 %v320_v1 }
  0x36   :  { %287 = vmatpush3.xpose.msk.msra.mxu0 %vm38_vm0, %v67_v38 }
  0x37   :  { %288 = vmatprep.subr.mxu0 %v320_v1 }
  0x3a   :  { %289 = vmatpush3.xpose.msk.msra.mxu0 %vm38_vm0, %v66_v39 }
  0x3b   :  { %290 = vmatprep.subr.mxu0 %v320_v1 }
  0x3e   :  { %291 = vmatpush3.xpose.msk.msra.mxu0 %vm38_vm0, %v65_v40 }
  0x41   :  { %293 = vmatmul.mubr.msk.f32.vlgmr.msra.gmra.mxu0 %vm38_vm0, %v64_v41 }
 0x101   :  { %v205_v43 = vpop.f32.mrf.mxu0 }
 0x102   :  { %v206_v44 = vadd.f32 %v225_v42, %v205_v43 }
 0x103   :  { %v294_v45 = vpop.f32.mrf.mxu0 }
 0x104   :  { %209 = vst [vmem:[#allocation3] sm:$0x3] %v206_v44 }
 0x105   :  { %309 = shalt.err (!%p306_p4)
}
 0x106   :  { %219 = dma.vmem_to_hbm [thread:$0]  %s217_s27, 32, %s454_s4, [#allocation4]  }
 0x107   :  { %318 = dma.done.wait [#allocation4], 32  }
 0x108   :  { %319 = vsyncadd [#allocation4], 4294967264 }
 0x109   :  { %223 = vsyncpa [#allocation4], 1 }

</bundles_post_ra>
